<compile_context>
chip_gen: v7x
topology: tpu7x:2x2x1
jax: 0.10.0
libtpu: 0.0.40
codegen_flags: <defaults>
</compile_context>

<pallas_src>
import jax
import jax.numpy as jnp
from jax import lax
from jax.experimental import pallas as pl
from jax.experimental.pallas import tpu as pltpu
import numpy as np

_VMEM_LIMIT = 48 * 1024 * 1024   # leave headroom on v7x (64 MiB physical)


def _round_up(n, m):
    return ((n + m - 1) // m) * m


def _largest_divisor_leq(n, target):
    t = max(1, min(n, target))
    while n % t != 0:
        t -= 1
    return t


# ----------------------------------------------------------------------------
# Kernels
# ----------------------------------------------------------------------------
def _matmul_bias_kernel(x_ref, w_ref, b_ref, o_ref):
    """(tile_rows, K) @ (K, N) + (1, N) -> (tile_rows, N)."""
    o_ref[...] = (
        jnp.dot(x_ref[...], w_ref[...], preferred_element_type=jnp.float32)
        + b_ref[...]
    ).astype(o_ref.dtype)


def _lstm_recurrent_kernel(g_ref, w_hh_ref, out_ref, h_sc, c_sc):
    """Recurrent part only (input projection already folded into g_ref).

    g_ref:    (tile_t, B_pad, 4*H_pad)  precomputed x@W_ih + b for this
              direction / time chunk
    w_hh_ref: (H_pad, 4*H_pad)
    out_ref:  (tile_t, B_pad, H_pad)    this direction's lane-half of the output
    h_sc/c_sc:(B_pad, H_pad) f32 scratch, persistent across time tiles
    """
    d = pl.program_id(0)     # 0 = forward, 1 = backward
    tt = pl.program_id(1)    # time-tile index (backward visits reversed chunks)
    tile_t = g_ref.shape[0]
    h_pad = h_sc.shape[1]

    @pl.when(tt == 0)
    def _():
        h_sc[...] = jnp.zeros_like(h_sc)
        c_sc[...] = jnp.zeros_like(c_sc)

    w_hh = w_hh_ref[...]     # hoist weight load out of the recurrence

    def step(t, carry):
        h, c = carry
        # forward walks the tile 0..tile_t-1; backward walks it in reverse
        t_loc = t + d * (tile_t - 1 - 2 * t)
        gates = g_ref[t_loc] + jnp.dot(
            h, w_hh, preferred_element_type=jnp.float32
        )                                                    # (B_pad, 4*H_pad)
        i_g = jax.nn.sigmoid(gates[:, 0 * h_pad:1 * h_pad])  # 128-lane aligned
        f_g = jax.nn.sigmoid(gates[:, 1 * h_pad:2 * h_pad])
        g_g = jnp.tanh(gates[:, 2 * h_pad:3 * h_pad])
        o_g = jax.nn.sigmoid(gates[:, 3 * h_pad:4 * h_pad])
        c_new = f_g * c + i_g * g_g
        h_new = o_g * jnp.tanh(c_new)
        out_ref[t_loc] = h_new.astype(out_ref.dtype)
        return (h_new, c_new)

    # keep h/c in vregs across steps; modest unroll lets MXU push / EUP / VPU
    # tails of adjacent steps interleave
    h_fin, c_fin = lax.fori_loop(
        0, tile_t, step, (h_sc[...], c_sc[...]), unroll=2
    )
    h_sc[...] = h_fin
    c_sc[...] = c_fin


# ----------------------------------------------------------------------------
# Wrappers
# ----------------------------------------------------------------------------
def input_projection(x2d, w_ih_all, b_all, *, tile_rows):
    """Hoisted gate GEMM for both directions.

    x2d: (rows, D_in);  w_ih_all: (2, D_in, 4*H_pad);  b_all: (2, 1, 4*H_pad)
    -> (2, rows, 4*H_pad)
    """
    rows, d_in = x2d.shape
    g4 = w_ih_all.shape[-1]
    return pl.pallas_call(
        _matmul_bias_kernel,
        out_shape=jax.ShapeDtypeStruct((2, rows, g4), jnp.float32),
        grid=(2, rows // tile_rows),
        in_specs=[
            pl.BlockSpec((tile_rows, d_in), lambda d, r: (r, 0)),
            pl.BlockSpec((None, d_in, g4), lambda d, r: (d, 0, 0)),
            pl.BlockSpec((None, 1, g4), lambda d, r: (d, 0, 0)),
        ],
        out_specs=pl.BlockSpec((None, tile_rows, g4), lambda d, r: (d, r, 0)),
        compiler_params=pltpu.CompilerParams(
            dimension_semantics=("parallel", "parallel"),
            vmem_limit_bytes=_VMEM_LIMIT,
        ),
    )(x2d, w_ih_all, b_all)


def lstm_bidir_layer(gates, w_hh_all, *, tile_t):
    """Both directions of one layer.

    gates: (2, T, B_pad, 4*H_pad);  w_hh_all: (2, H_pad, 4*H_pad)
    -> (T, B_pad, 2*H_pad)  (fwd in lanes [0:H_pad], bwd in [H_pad:2*H_pad])
    """
    _, T, b_pad, g4 = gates.shape
    h_pad = g4 // 4
    n_t = T // tile_t

    def rev(d, tt):  # tt for fwd, n_t-1-tt for bwd (pure index arithmetic)
        return tt + d * (n_t - 1 - 2 * tt)

    return pl.pallas_call(
        _lstm_recurrent_kernel,
        out_shape=jax.ShapeDtypeStruct((T, b_pad, 2 * h_pad), jnp.float32),
        grid=(2, n_t),
        in_specs=[
            pl.BlockSpec(
                (None, tile_t, b_pad, g4),
                lambda d, tt: (d, rev(d, tt), 0, 0),
            ),
            pl.BlockSpec((None, h_pad, g4), lambda d, tt: (d, 0, 0)),
        ],
        out_specs=pl.BlockSpec(
            (tile_t, b_pad, h_pad), lambda d, tt: (rev(d, tt), 0, d)
        ),
        scratch_shapes=[
            pltpu.VMEM((b_pad, h_pad), jnp.float32),
            pltpu.VMEM((b_pad, h_pad), jnp.float32),
        ],
        compiler_params=pltpu.CompilerParams(
            dimension_semantics=("parallel", "arbitrary"),
            vmem_limit_bytes=_VMEM_LIMIT,
        ),
    )(gates, w_hh_all)


def linear(x2d, w_t, b, *, tile_rows):
    """x2d: (rows, D_in) @ w_t: (D_in, D_out) + b: (1, D_out)."""
    rows, d_in = x2d.shape
    d_out = w_t.shape[1]
    return pl.pallas_call(
        _matmul_bias_kernel,
        out_shape=jax.ShapeDtypeStruct((rows, d_out), jnp.float32),
        grid=(rows // tile_rows,),
        in_specs=[
            pl.BlockSpec((tile_rows, d_in), lambda r: (r, 0)),
            pl.BlockSpec((d_in, d_out), lambda r: (0, 0)),
            pl.BlockSpec((1, d_out), lambda r: (0, 0)),
        ],
        out_specs=pl.BlockSpec((tile_rows, d_out), lambda r: (r, 0)),
        compiler_params=pltpu.CompilerParams(
            dimension_semantics=("parallel",),
            vmem_limit_bytes=_VMEM_LIMIT,
        ),
    )(x2d, w_t, b)


# ----------------------------------------------------------------------------
# Parameters (PyTorch-style layout) + packing into padded kernel layout
# ----------------------------------------------------------------------------
def init_params(key, num_input, num_hidden, num_output):
    H = num_hidden
    k_lstm = 1.0 / np.sqrt(H)
    params = {}
    layer_inputs = [num_input, 2 * H]
    for layer in range(2):
        d_in = layer_inputs[layer]
        for direction in ("fwd", "bwd"):
            key, k1, k2, k3, k4 = jax.random.split(key, 5)
            params[f"l{layer}_{direction}"] = {
                "w_ih": jax.random.uniform(k1, (4 * H, d_in), jnp.float32, -k_lstm, k_lstm),
                "w_hh": jax.random.uniform(k2, (4 * H, H), jnp.float32, -k_lstm, k_lstm),
                "b_ih": jax.random.uniform(k3, (4 * H,), jnp.float32, -k_lstm, k_lstm),
                "b_hh": jax.random.uniform(k4, (4 * H,), jnp.float32, -k_lstm, k_lstm),
            }
    k_lin = 1.0 / np.sqrt(2 * H)
    key, k1, k2 = jax.random.split(key, 3)
    params["emb_w"] = jax.random.uniform(k1, (num_output, 2 * H), jnp.float32, -k_lin, k_lin)
    params["emb_b"] = jax.random.uniform(k2, (num_output,), jnp.float32, -k_lin, k_lin)
    return params


def pack_params(params, num_hidden, num_output):
    """Pad/permute PyTorch weights into the lane-aligned kernel layout."""
    H = num_hidden
    H_pad = _round_up(H, 128)
    N_out_pad = _round_up(num_output, 128)

    def pad_gate_cols(w_t):  # (rows, 4H) -> (rows, 4*H_pad), gate g at g*H_pad
        rows = w_t.shape[0]
        out = np.zeros((rows, 4 * H_pad), np.float32)
        for g in range(4):
            out[:, g * H_pad:g * H_pad + H] = w_t[:, g * H:(g + 1) * H]
        return out

    def pad_hidden_rows(w, n_blocks):  # remap (n_blocks*H, N) -> (n_blocks*H_pad, N)
        out = np.zeros((n_blocks * H_pad, w.shape[1]), np.float32)
        for blk in range(n_blocks):
            out[blk * H_pad:blk * H_pad + H] = w[blk * H:(blk + 1) * H]
        return out

    packed = {"H_pad": H_pad, "num_output": num_output}
    for layer in range(2):
        w_ih_list, w_hh_list, b_list = [], [], []
        for direction in ("fwd", "bwd"):
            p = params[f"l{layer}_{direction}"]
            w_ih_p = pad_gate_cols(np.asarray(p["w_ih"]).T)       # (D_in, 4*H_pad)
            if layer == 1:                                        # input = [h_fwd|h_bwd] padded
                w_ih_p = pad_hidden_rows(w_ih_p, 2)               # (2*H_pad, 4*H_pad)
            w_hh_p = np.zeros((H_pad, 4 * H_pad), np.float32)
            w_hh_p[:H] = pad_gate_cols(np.asarray(p["w_hh"]).T)
            b = np.asarray(p["b_ih"]) + np.asarray(p["b_hh"])
            b_p = pad_gate_cols(b[None, :])                       # (1, 4*H_pad)
            w_ih_list.append(w_ih_p)
            w_hh_list.append(w_hh_p)
            b_list.append(b_p)
        packed[f"layer{layer}"] = {
            "w_ih_all": jnp.asarray(np.stack(w_ih_list)),   # (2, D_in_eff, 4*H_pad)
            "w_hh_all": jnp.asarray(np.stack(w_hh_list)),   # (2, H_pad, 4*H_pad)
            "b_all": jnp.asarray(np.stack(b_list)),         # (2, 1, 4*H_pad)
        }
    w_t = np.asarray(params["emb_w"]).T                     # (2H, num_output)
    w_t_p = np.zeros((2 * H_pad, N_out_pad), np.float32)
    w_t_p[:H, :num_output] = w_t[:H]
    w_t_p[H_pad:H_pad + H, :num_output] = w_t[H:2 * H]
    b_p = np.zeros((1, N_out_pad), np.float32)
    b_p[0, :num_output] = np.asarray(params["emb_b"])
    packed["emb_w_t"] = jnp.asarray(w_t_p)
    packed["emb_b"] = jnp.asarray(b_p)
    return packed


# ----------------------------------------------------------------------------
# Full forward pass
# ----------------------------------------------------------------------------
def bilstm_forward(x, packed):
    """x: (T, B, num_input) -> (T, B, num_output)."""
    T, B, d_in = x.shape
    H_pad = packed["H_pad"]
    B_pad = _round_up(B, 8)

    # One-time batch pad to 8 sublanes (padded rows never mix with real rows).
    x_p = jnp.pad(x, ((0, 0), (0, B_pad - B), (0, 0)))
    layer_in = x_p.reshape(T * B_pad, d_in)

    rows = T * B_pad
    gemm_tile_rows = B_pad * _largest_divisor_leq(T, 128)
    rec_tile_t = _largest_divisor_leq(T, 64)

    for layer in (0, 1):
        lw = packed[f"layer{layer}"]
        gates2d = input_projection(
            layer_in, lw["w_ih_all"], lw["b_all"], tile_rows=gemm_tile_rows
        )                                                   # (2, rows, 4*H_pad)
        gates = gates2d.reshape(2, T, B_pad, 4 * H_pad)
        out = lstm_bidir_layer(gates, lw["w_hh_all"], tile_t=rec_tile_t)
        layer_in = out.reshape(rows, 2 * H_pad)             # next layer's input

    y = linear(layer_in, packed["emb_w_t"], packed["emb_b"],
               tile_rows=gemm_tile_rows)                    # (rows, N_out_pad)
    n_out = packed["num_output"]
    return y.reshape(T, B_pad, -1)[:, :B, :n_out]


# ----------------------------------------------------------------------------
# Pure-JAX reference (PyTorch semantics) for correctness check
# ----------------------------------------------------------------------------
def _ref_lstm_layer(x, w_ih, w_hh, b_ih, b_hh):
    T, B, _ = x.shape
    H = w_hh.shape[1]
    w_ih_t, w_hh_t = w_ih.T, w_hh.T
    b = (b_ih + b_hh)[None, :]

    def step(carry, x_t):
        h, c = carry
        gates = x_t @ w_ih_t + h @ w_hh_t + b
        i = jax.nn.sigmoid(gates[:, 0 * H:1 * H])
        f = jax.nn.sigmoid(gates[:, 1 * H:2 * H])
        g = jnp.tanh(gates[:, 2 * H:3 * H])
        o = jax.nn.sigmoid(gates[:, 3 * H:4 * H])
        c_new = f * c + i * g
        h_new = o * jnp.tanh(c_new)
        return (h_new, c_new), h_new

    init = (jnp.zeros((B, H), jnp.float32), jnp.zeros((B, H), jnp.float32))
    _, hs = lax.scan(step, init, x)
    return hs


def _ref_forward(x, params):
    y = x
    for layer in range(2):
        pf = params[f"l{layer}_fwd"]
        pb = params[f"l{layer}_bwd"]
        h_f = _ref_lstm_layer(y, pf["w_ih"], pf["w_hh"], pf["b_ih"], pf["b_hh"])
        h_b = jnp.flip(
            _ref_lstm_layer(jnp.flip(y, 0), pb["w_ih"], pb["w_hh"], pb["b_ih"], pb["b_hh"]), 0
        )
        y = jnp.concatenate([h_f, h_b], -1)
    T, b, h = y.shape
    out = y.reshape(T * b, h) @ params["emb_w"].T + params["emb_b"][None, :]
    return out.reshape(T, b, -1)


# ----------------------------------------------------------------------------
if __name__ == "__main__":
    T, B = 8, 2
    num_input, num_hidden, num_output = 16, 32, 8

    key = jax.random.PRNGKey(0)
    k_param, k_x = jax.random.split(key)
    params = init_params(k_param, num_input, num_hidden, num_output)
    packed = pack_params(params, num_hidden, num_output)
    x = jax.random.normal(k_x, (T, B, num_input), jnp.float32)

    out = jax.block_until_ready(bilstm_forward(x, packed))
    assert out.shape == (T, B, num_output), out.shape

    ref = jax.block_until_ready(_ref_forward(x, params))
    np.testing.assert_allclose(np.asarray(out), np.asarray(ref), rtol=5e-3, atol=5e-3)

    print("KERNEL_OK")
</pallas_src>

<mosaic_0001>
module attributes {stable_mosaic.version = 11 : i64} {
  func.func @_matmul_bias_kernel(%arg0: i32, %arg1: i32, %arg2: memref<64x16xf32, #tpu.memory_space<vmem>>, %arg3: memref<1x16x512xf32, #tpu.memory_space<vmem>>, %arg4: memref<1x1x512xf32, #tpu.memory_space<vmem>>, %arg5: memref<1x64x512xf32, #tpu.memory_space<vmem>>) attributes {dimension_semantics = [#tpu.dimension_semantics<parallel>, #tpu.dimension_semantics<parallel>], iteration_bounds = array<i64: 2, 1>, scalar_prefetch = 0 : i64, scratch_operands = 0 : i64, tpu.core_type = #tpu.core_type<tc>, window_params = [{transform_indices = @transform_0, window_bounds = array<i64: 64, 16>}, {transform_indices = @transform_1, window_bounds = array<i64: 1, 16, 512>}, {transform_indices = @transform_2, window_bounds = array<i64: 1, 1, 512>}, {transform_indices = @transform_3, window_bounds = array<i64: 1, 64, 512>}]} {
    %c0 = arith.constant 0 : index
    %c0_0 = arith.constant 0 : index
    %0 = vector.load %arg2[%c0, %c0_0] : memref<64x16xf32, #tpu.memory_space<vmem>>, vector<64x16xf32>
    %c0_1 = arith.constant 0 : index
    %c0_2 = arith.constant 0 : index
    %c0_3 = arith.constant 0 : index
    %1 = vector.load %arg3[%c0_1, %c0_2, %c0_3] : memref<1x16x512xf32, #tpu.memory_space<vmem>>, vector<1x16x512xf32>
    %2 = vector.shape_cast %1 : vector<1x16x512xf32> to vector<16x512xf32>
    %cst = arith.constant dense<0.000000e+00> : vector<64x512xf32>
    %3 = tpu.matmul %0, %2, %cst {dimension_numbers = #tpu.dot_dimension_numbers<[1], [0], [0], [1], [0, 0, 1, 1], [], []>} : vector<64x16xf32>, vector<16x512xf32>, vector<64x512xf32> -> vector<64x512xf32>
    %c0_4 = arith.constant 0 : index
    %c0_5 = arith.constant 0 : index
    %c0_6 = arith.constant 0 : index
    %4 = vector.load %arg4[%c0_4, %c0_5, %c0_6] : memref<1x1x512xf32, #tpu.memory_space<vmem>>, vector<1x1x512xf32>
    %5 = vector.shape_cast %4 : vector<1x1x512xf32> to vector<1x512xf32>
    %6 = vector.broadcast %5 : vector<1x512xf32> to vector<64x512xf32>
    %7 = arith.addf %3, %6 : vector<64x512xf32>
    %c0_7 = arith.constant 0 : index
    %c0_8 = arith.constant 0 : index
    %c0_9 = arith.constant 0 : index
    %8 = vector.load %arg5[%c0_7, %c0_8, %c0_9] : memref<1x64x512xf32, #tpu.memory_space<vmem>>, vector<1x64x512xf32>
    %9 = vector.shape_cast %8 : vector<1x64x512xf32> to vector<64x512xf32>
    %10 = vector.shape_cast %7 : vector<64x512xf32> to vector<1x64x512xf32>
    tpu.vector_store %arg5[%c0_7, %c0_8, %c0_9], %10 {strides = array<i32>} : memref<1x64x512xf32, #tpu.memory_space<vmem>>, vector<1x64x512xf32>,
    return
  }
  func.func @transform_0(%arg0: i32, %arg1: i32) -> (i32, i32) {
    %c0_i32 = arith.constant 0 : i32
    %c0_i32_0 = arith.constant 0 : i32
    return %arg1, %c0_i32 : i32, i32
  }
  func.func @transform_1(%arg0: i32, %arg1: i32) -> (i32, i32, i32) {
    %c0_i32 = arith.constant 0 : i32
    %c0_i32_0 = arith.constant 0 : i32
    %c0_i32_1 = arith.constant 0 : i32
    return %arg0, %c0_i32, %c0_i32_0 : i32, i32, i32
  }
  func.func @transform_2(%arg0: i32, %arg1: i32) -> (i32, i32, i32) {
    %c0_i32 = arith.constant 0 : i32
    %c0_i32_0 = arith.constant 0 : i32
    %c0_i32_1 = arith.constant 0 : i32
    return %arg0, %c0_i32, %c0_i32_0 : i32, i32, i32
  }
  func.func @transform_3(%arg0: i32, %arg1: i32) -> (i32, i32, i32) {
    %c0_i32 = arith.constant 0 : i32
    %c0_i32_0 = arith.constant 0 : i32
    return %arg0, %arg1, %c0_i32 : i32, i32, i32
  }
}

</mosaic_0001>

<bundles_post_ra>
// kernel: tpu_custom_call.1
= control target key start
LH: loop header
LB: loop body
LE: loop exit
PB: predicated region body
PF: predicated region fallthrough
CT: control target
= control target key end

     0   :  { %8 = vsyncpa [#allocation3], 0  ;;  %s1239_s0 = inlined_call_operand.vmem [shape: f32[64,16], index: 0, kind: input, shape index: {}]   ;;  %s1240_s1 = inlined_call_operand.hbm [shape: f32[2,16,512], index: 1, kind: input, shape index: {}]   ;;  %s1241_s2 = inlined_call_operand.vmem [shape: f32[2,1,512], index: 2, kind: input, shape index: {}]   ;;  %s1242_s3 = inlined_call_operand.hbm [shape: f32[2,64,512], index: 3, kind: output, shape index: {}]  }
   0x1   :  { %10 = vsyncpa [#allocation3 + $0x1], 0 }
   0x2   :  { %11 = vsyncpa [#allocation4], 0 }
   0x3   :  { %13 = vsyncpa [#allocation4 + $0x1], 0  ;;  %s943_s12 = smov 0   ;;  %s945_s13 = smov 0  }
   0x4   :  { %s947_s14 = smov 0   ;;  %s949_s15 = smov 0  }
   0x5   :  { %s951_s16 = smov 0   ;;  %s953_s17 = smov 0  }
   0x6 LB: > { %s692_s18 = sadd.s32 4294967295, %s914_s17   ;;  %s693_s19 = sadd.s32 4294967294, %s914_s17   ;;  %s914_s17 = sphi %s953_s17, %s19_s17   ;;  %s910_s16 = sphi %s951_s16, %s1257_s16   ;;  %s906_s15 = sphi %s949_s15, %s1256_s15   ;;  %s902_s14 = sphi %s947_s14, %s1255_s14   ;;  %s898_s13 = sphi %s945_s13, %s1254_s13   ;;  %s894_s12 = sphi %s943_s12, %s1253_s12  }
   0x7   : > { %s31_s20 = sadd.s32 1, %s910_s16  ;;  %s64_s21 = sadd.s32 1, %s902_s14 }
   0x8   : > { %p33_p0 = scmp.ge.s32.totalorder %s31_s20, 2  ;;  %p71_p1 = scmp.ne.s32.totalorder %s902_s14, %s898_s13 }
   0x9   : > { %p72_p2 = scmp.eq.s32.totalorder %s914_s17, 0  ;;  %p77_p3 = scmp.ne.s32.totalorder %s898_s13, %s894_s12 }
   0xa   : > { %s1259_s20 = smov (%p33_p0, %s31_s20), 0  ;;  %p78_p5 = scmp.eq.s32.totalorder %s692_s18, 0 }
   0xb   : > { %p984_p4 = por %p72_p2, %p71_p1  ;;  %s61_s23 = ssub.s32 %s910_s16, %s1259_s20 }
   0xc   : > { %p129_p6 = scmp.eq.s32.totalorder %s692_s18, 1  ;;  %p62_p7 = scmp.eq.s32.totalorder %s61_s23, 0 }
   0xd   : > { %p990_p8 = por %p78_p5, %p77_p3  ;;  %p135_p10 = scmp.eq.s32.totalorder %s693_s19, 1 }
   0xe   : > { %p994_p9 = por %p129_p6, %p71_p1  ;;  %p747_p13 = scmp.lt.s32.totalorder %s914_s17, 2 }
   0xf   : > { %s999_s26 = scalar_select %p62_p7, %s902_s14, %s64_s21  }
  0x10   : > { %s1246_s25 = scalar_select %p994_p9, 1, 0 }
  0x11   : > { %p1001_p11 = por %p135_p10, %p77_p3  ;;  %s164_s28 = sand.u32 1, %s902_s14  }
  0x12   : > { %s697_s29 = sshll.u32 %s164_s28, 6  ;;  %s725_s30 = sshll.u32 %s910_s16, 10 }
  0x13   : > { %s1247_s27 = scalar_select %p1001_p11, 1, 0 }
  0x14   : > { %s1012_s6 = scalar_lea.hbm %s1240_s1, %s725_s30  ;;  %s168_s7 = scalar_lea.vmem [#allocation2], %s697_s29 }
  0x15   : > { %s175_s8 = sshll.u32 %s168_s7, 4  ;;  %p1018_p0 = pnand %p747_p13, %p984_p4  ;;  %s1014_s8 = int_to_ptr.vmem [resolvable:$true] %s175_s8 }
  0x16   : > { %s1023_s10 = scalar_lea.sflag [#allocation3], %s164_s28  ;;  %s802_s11 = scalar_lea.hbm %s1012_s6, 1024 }
  0x17   : > { %p803_p2 = scmp.ne.s32.totalorder %s1012_s6, %s802_s11  ;;  %p804_p3 = pneg %p1018_p0 }
  0x18   : > { %s807_s21 = scalar_lea.hbm %s1240_s1, 2048  ;;  %p808_p4 = scmp.lt.u32.totalorder %s1012_s6, %s1240_s1 }
  0x19   : > { %p805_p5 = pnand %p804_p3, %p803_p2  ;;  %p809_p7 = scmp.lt.u32.totalorder %s807_s21, %s802_s11 }
  0x1a   : > { %p811_p13 = scmp.lt.u32.totalorder %s802_s11, %s1012_s6 }
  0x1b   : > { %p806_p6 = pneg %p805_p5  ;;  %p810_p10 = por %p809_p7, %p808_p4 }
  0x1d   : > { %p812_p12 = por %p811_p13, %p810_p10 }
  0x1f   : > { %p813_p1 = pnand %p812_p12, %p806_p6 }
  0x21   : > { %816 = shalt.err (!%p813_p1)
}
  0x22   : > { %s817_s28 = scalar_lea.vmem %s1014_s8, 1024  ;;  %s916_s29 = smov [#allocation2]  }
  0x23   : > { %p818_p2 = scmp.ne.s32.totalorder %s1014_s8, %s817_s28  ;;  %s822_s30 = sshll.u32 %s916_s29, 4  ;;  %s823_s30 = int_to_ptr.vmem [resolvable:$false] %s822_s30 }
  0x24   : > { %s824_s4 = scalar_lea.vmem %s823_s30, 2048  ;;  %p825_p9 = scmp.lt.s32.totalorder %s1014_s8, %s823_s30 }
  0x25   : > { %p820_p5 = pnand %p818_p2, %p804_p3  ;;  %p826_p4 = scmp.lt.s32.totalorder %s824_s4, %s817_s28 }
  0x27   : > { %p821_p11 = pneg %p820_p5  ;;  %p827_p7 = por %p826_p4, %p825_p9 }
  0x29   : > { %p828_p10 = pnand %p827_p7, %p821_p11 }
  0x2b   : > { %831 = shalt.err (!%p828_p10)
}
  0x2c   : > { %s917_s5 = smov 512   ;;  %s918_s7 = smov 32  }
  0x2d   : > { %742 = dma.hbm_to_vmem [thread:$0]  (!%p1018_p0), %s1012_s6, 1024, %s1014_s8, %s1023_s10, %s917_s5, %s917_s5, %s918_s7  }
  0x2e   : > { %p190_p12 = scmp.lt.s32.totalorder %s914_s17, 3  ;;  %p1249_p1 = scmp.ge.s32.totalorder %s914_s17, 1 }
  0x30   : > { %p191_p3 = pnand %p1249_p1, %p190_p12 }
  0x31   : > { %s1055_s11 = sand.u32 (!%p191_p3), 1, %s898_s13  }
  0x32   : > { %194 = sbr.rel (%p191_p3) target bundleno = 325 (0x145), region = 32  ;;  %s701_s18 = sshll.u32 (!%p191_p3), %s1055_s11, 6 }
  0x33   : > { %s197_s19 = scalar_lea.sflag (!%p191_p3), [#allocation3], %s1055_s11  ;;  %s200_s21 = scalar_lea.vmem (!%p191_p3), [#allocation2], %s701_s18 }
  0x39   : > { %885 = dma.done.wait (%p990_p8), %s197_s19, 1024  }
  0x3a   : > { %887 = vsyncadd (%p990_p8), %s197_s19, 4294966272  ;;  %v919_v0 = vmov 0.0   ;;  %v252_v1 = vld [vmem:[%s200_s21 + $0x8] sm:$0xff]  ;;  %v254_v3 = vld [vmem:[%s200_s21 + $0x18] sm:$0xff]  ;;  %vm281_vm0 = vcmask 130048   ;;  %p238_p8 = scmp.lt.s32.totalorder %s906_s15, 1  ;;  %v261_v21 = vlaneseq }
  0x3b   : > { %370 = vmatprep.mubr.f32.mxu0 %v919_v0  ;;  %483 = vmatprep.mubr.f32.mxu1 %v919_v0  ;;  %v256_v2 = vld [vmem:[%s200_s21 + $0x28] sm:$0xff]  ;;  %v258_v5 = vld [vmem:[%s200_s21 + $0x38] sm:$0xff]  ;;  %v251_v6 = vld [vmem:[%s200_s21] sm:$0xff]  ;;  %s702_s22 = sshll.u32 %s1055_s11, 8  ;;  %s726_s28 = sshll.u32 %s906_s15, 12 }
  0x3c   : > { %v727_v4 = vpack.c.bf16 %v256_v2, %v252_v1  ;;  %v255_v7 = vld [vmem:[%s200_s21 + $0x20] sm:$0xff]  ;;  %v731_v8 = vpack.c.bf16 %v258_v5, %v254_v3  ;;  %v253_v10 = vld [vmem:[%s200_s21 + $0x10] sm:$0xff]  ;;  %v244_v14 = vld [vmem:[%s1239_s0 + $0x8] sm:$0xff]  ;;  %s239_s24 = scalar_select %p238_p8, %s906_s15, 1  ;;  %v262_v22 = vshrl.u32 %v261_v21, 7 }
  0x3d   : > { %v729_v9 = vpack.c.bf16 %v255_v7, %v251_v6  ;;  %v257_v11 = vld [vmem:[%s200_s21 + $0x30] sm:$0xff]  ;;  %v243_v13 = vld [vmem:[%s1239_s0] sm:$0xff]  ;;  %v246_v16 = vld [vmem:[%s1239_s0 + $0x18] sm:$0xff]  ;;  %s1120_s23 = scalar_lea.vmem [#allocation5], %s702_s22  ;;  %s1183_s4 = scalar_lea.hbm %s1242_s3, %s726_s28 }
  0x3e   : > { %728 = vmatprep.subr.bf16.mxu0 %v727_v4  ;;  %v733_v12 = vpack.c.bf16 %v257_v11, %v253_v10  ;;  %732 = vmatprep.subr.bf16.mxu1 %v731_v8  ;;  %v245_v15 = vld [vmem:[%s1239_s0 + $0x10] sm:$0xff]  ;;  %v247_v17 = vld [vmem:[%s1239_s0 + $0x20] sm:$0xff]  ;;  %v248_v18 = vld [vmem:[%s1239_s0 + $0x28] sm:$0xff]  ;;  %s703_s6 = sshll.u32 %s239_s24, 2  ;;  %v263_v23 = vsub.s32 0, %v262_v22  ;;  %v271_v25 = vsub.s32 2, %v262_v22 }
  0x3f   : > { %730 = vmatpush1.bf16.msra.mxu0 %v729_v9  ;;  %v249_v19 = vld [vmem:[%s1239_s0 + $0x30] sm:$0xff]  ;;  %v250_v20 = vld [vmem:[%s1239_s0 + $0x38] sm:$0xff]  ;;  %s241_s10 = scalar_lea.vmem %s1241_s2, %s703_s6  ;;  %v267_v26 = vsub.s32 1, %v262_v22  ;;  %v275_v27 = vsub.s32 3, %v262_v22  ;;  %s581_s29 = sshll.u32 %s1120_s23, 4  ;;  %s1185_s29 = int_to_ptr.vmem [resolvable:$true] %s581_s29 }
  0x40   : > { %734 = vmatpush1.bf16.msra.mxu1 %v733_v12  ;;  %v259_v24 = vld [vmem:[%s241_s10] sm:$0xf]  ;;  %s565_s5 = scalar_lea.sflag [#allocation4], %s1055_s11  ;;  %s832_s7 = scalar_lea.vmem %s1185_s29, 4096 }
  0x41   : > { %v1109_v28 = vrot.slane %v259_v24, %v263_v23  ;;  %v1111_v29 = vrot.slane %v259_v24, %v271_v25  ;;  %v1113_v30 = vrot.slane %v259_v24, %v267_v26  ;;  %v1115_v31 = vrot.slane %v259_v24, %v275_v27  ;;  %p833_p9 = scmp.ne.s32.totalorder %s1185_s29, %s832_s7  ;;  %p1250_p11 = scmp.ne.s32.totalorder %s1246_s25, 0 }
  0x42   : > { %704 = vmatmul.mubr.msk.f32.vlgmr.msra.gmra.mrb[0].mxu0 %vm281_vm0, %v243_v13  ;;  %s920_s18 = smov [#allocation5]  }
  0x43   : > { %712 = vmatmul.mubr.msk.f32.vlgmr.msra.gmra.mrb[0].mxu1 %vm281_vm0, %v243_v13  ;;  %376 = vmatprep.mubr.f32.mxu0 %v919_v0  ;;  %p834_p0 = pnand %p833_p9, %p1250_p11  ;;  %s836_s19 = sshll.u32 %s920_s18, 4  ;;  %s837_s19 = int_to_ptr.vmem [resolvable:$false] %s836_s19 }
  0x44   : > { %489 = vmatprep.mubr.f32.mxu1 %v919_v0  ;;  %s838_s21 = scalar_lea.vmem %s837_s19, 8192  ;;  %p839_p13 = scmp.lt.s32.totalorder %s1185_s29, %s837_s19 }
  0x45   : > { %p835_p6 = pneg %p834_p0  ;;  %p840_p2 = scmp.lt.s32.totalorder %s838_s21, %s832_s7 }
  0x46   : > { %705 = vmatmul.mubr.msk.f32.gmra.mrb[2].mxu0 %vm281_vm0, %v244_v14 }
  0x47   : > { %713 = vmatmul.mubr.msk.f32.gmra.mrb[2].mxu1 %vm281_vm0, %v244_v14  ;;  %382 = vmatprep.mubr.f32.mxu0 %v919_v0  ;;  %p841_p5 = por %p840_p2, %p839_p13 }
  0x48   : > { %495 = vmatprep.mubr.f32.mxu1 %v919_v0 }
  0x49   : > { %p842_p4 = pnand %p841_p5, %p835_p6 }
  0x4a   : > { %706 = vmatmul.mubr.msk.f32.gmra.mrb[4].mxu0 %vm281_vm0, %v245_v15 }
  0x4b   : > { %714 = vmatmul.mubr.msk.f32.gmra.mrb[4].mxu1 %vm281_vm0, %v245_v15  ;;  %388 = vmatprep.mubr.f32.mxu0 %v919_v0 }
  0x4c   : > { %501 = vmatprep.mubr.f32.mxu1 %v919_v0 }
  0x4e   : > { %707 = vmatmul.mubr.msk.f32.gmra.mrb[6].mxu0 %vm281_vm0, %v246_v16 }
  0x4f   : > { %715 = vmatmul.mubr.msk.f32.gmra.mrb[6].mxu1 %vm281_vm0, %v246_v16  ;;  %394 = vmatprep.mubr.f32.mxu0 %v919_v0 }
  0x50   : > { %507 = vmatprep.mubr.f32.mxu1 %v919_v0 }
  0x52   : > { %708 = vmatmul.mubr.msk.f32.gmra.mrb[8].mxu0 %vm281_vm0, %v247_v17 }
  0x53   : > { %716 = vmatmul.mubr.msk.f32.gmra.mrb[8].mxu1 %vm281_vm0, %v247_v17  ;;  %400 = vmatprep.mubr.f32.mxu0 %v919_v0 }
  0x54   : > { %513 = vmatprep.mubr.f32.mxu1 %v919_v0 }
  0x56   : > { %709 = vmatmul.mubr.msk.f32.gmra.mrb[10].mxu0 %vm281_vm0, %v248_v18 }
  0x57   : > { %717 = vmatmul.mubr.msk.f32.gmra.mrb[10].mxu1 %vm281_vm0, %v248_v18  ;;  %406 = vmatprep.mubr.f32.mxu0 %v919_v0 }
  0x58   : > { %519 = vmatprep.mubr.f32.mxu1 %v919_v0 }
  0x5a   : > { %710 = vmatmul.mubr.msk.f32.gmra.mrb[12].mxu0 %vm281_vm0, %v249_v19 }
  0x5b   : > { %718 = vmatmul.mubr.msk.f32.gmra.mrb[12].mxu1 %vm281_vm0, %v249_v19  ;;  %412 = vmatprep.mubr.f32.mxu0 %v919_v0 }
  0x5c   : > { %525 = vmatprep.mubr.f32.mxu1 %v919_v0 }
  0x5e   : > { %711 = vmatmul.mubr.msk.f32.gmra.mrb[14].mxu0 %vm281_vm0, %v250_v20 }
  0x5f   : > { %719 = vmatmul.mubr.msk.f32.gmra.mrb[14].mxu1 %vm281_vm0, %v250_v20 }
 0x115   : > { %v372_v32 = vpop.f32.mrb[0].mxu0 }
 0x116   : > { %v373_v33 = vadd.f32 %v372_v32, %v1109_v28  ;;  %v485_v34 = vpop.f32.mrb[0].mxu1  ;;  %v374_v35 = vpop.f32.mrb[1].mxu0 }
 0x117   : > { %v486_v36 = vadd.f32 %v485_v34, %v1111_v29  ;;  %v375_v37 = vadd.f32 %v374_v35, %v1113_v30  ;;  %v487_v38 = vpop.f32.mrb[1].mxu1 }
 0x118   : > { %532 = vst [vmem:[%s1120_s23] sm:$0xff] %v373_v33  ;;  %v488_v39 = vadd.f32 %v487_v38, %v1115_v31 }
 0x119   : > { %534 = vst [vmem:[%s1120_s23 + $0x10] sm:$0xff] %v486_v36  ;;  %533 = vst [vmem:[%s1120_s23 + $0x8] sm:$0xff] %v375_v37  ;;  %v378_v40 = vpop.f32.mrb[2].mxu0 }
 0x11a   : > { %535 = vst [vmem:[%s1120_s23 + $0x18] sm:$0xff] %v488_v39  ;;  %v379_v41 = vadd.f32 %v378_v40, %v1109_v28  ;;  %v491_v42 = vpop.f32.mrb[2].mxu1  ;;  %v380_v43 = vpop.f32.mrb[3].mxu0 }
 0x11b   : > { %v492_v44 = vadd.f32 %v491_v42, %v1111_v29  ;;  %v381_v45 = vadd.f32 %v380_v43, %v1113_v30  ;;  %v493_v46 = vpop.f32.mrb[3].mxu1 }
 0x11c   : > { %536 = vst [vmem:[%s1120_s23 + $0x20] sm:$0xff] %v379_v41  ;;  %v494_v47 = vadd.f32 %v493_v46, %v1115_v31 }
 0x11d   : > { %538 = vst [vmem:[%s1120_s23 + $0x30] sm:$0xff] %v492_v44  ;;  %537 = vst [vmem:[%s1120_s23 + $0x28] sm:$0xff] %v381_v45  ;;  %v384_v48 = vpop.f32.mrb[4].mxu0 }
 0x11e   : > { %539 = vst [vmem:[%s1120_s23 + $0x38] sm:$0xff] %v494_v47  ;;  %v385_v49 = vadd.f32 %v384_v48, %v1109_v28  ;;  %v497_v50 = vpop.f32.mrb[4].mxu1  ;;  %v386_v51 = vpop.f32.mrb[5].mxu0 }
 0x11f   : > { %v498_v52 = vadd.f32 %v497_v50, %v1111_v29  ;;  %v387_v53 = vadd.f32 %v386_v51, %v1113_v30  ;;  %v499_v54 = vpop.f32.mrb[5].mxu1 }
 0x120   : > { %540 = vst [vmem:[%s1120_s23 + $0x40] sm:$0xff] %v385_v49  ;;  %v500_v55 = vadd.f32 %v499_v54, %v1115_v31 }
 0x121   : > { %542 = vst [vmem:[%s1120_s23 + $0x50] sm:$0xff] %v498_v52  ;;  %541 = vst [vmem:[%s1120_s23 + $0x48] sm:$0xff] %v387_v53  ;;  %v390_v56 = vpop.f32.mrb[6].mxu0 }
 0x122   : > { %543 = vst [vmem:[%s1120_s23 + $0x58] sm:$0xff] %v500_v55  ;;  %v391_v57 = vadd.f32 %v390_v56, %v1109_v28  ;;  %v503_v58 = vpop.f32.mrb[6].mxu1  ;;  %v392_v59 = vpop.f32.mrb[7].mxu0 }
 0x123   : > { %v504_v60 = vadd.f32 %v503_v58, %v1111_v29  ;;  %v393_v61 = vadd.f32 %v392_v59, %v1113_v30  ;;  %v505_v62 = vpop.f32.mrb[7].mxu1 }
 0x124   : > { %544 = vst [vmem:[%s1120_s23 + $0x60] sm:$0xff] %v391_v57  ;;  %v506_v63 = vadd.f32 %v505_v62, %v1115_v31 }
 0x125   : > { %546 = vst [vmem:[%s1120_s23 + $0x70] sm:$0xff] %v504_v60  ;;  %545 = vst [vmem:[%s1120_s23 + $0x68] sm:$0xff] %v393_v61  ;;  %v396_v0 = vpop.f32.mrb[8].mxu0 }
 0x126   : > { %547 = vst [vmem:[%s1120_s23 + $0x78] sm:$0xff] %v506_v63  ;;  %v397_v1 = vadd.f32 %v396_v0, %v1109_v28  ;;  %v509_v2 = vpop.f32.mrb[8].mxu1  ;;  %v398_v3 = vpop.f32.mrb[9].mxu0 }
 0x127   : > { %v510_v4 = vadd.f32 %v509_v2, %v1111_v29  ;;  %v399_v5 = vadd.f32 %v398_v3, %v1113_v30  ;;  %v511_v6 = vpop.f32.mrb[9].mxu1 }
 0x128   : > { %548 = vst [vmem:[%s1120_s23 + $0x80] sm:$0xff] %v397_v1  ;;  %v512_v7 = vadd.f32 %v511_v6, %v1115_v31 }
 0x129   : > { %550 = vst [vmem:[%s1120_s23 + $0x90] sm:$0xff] %v510_v4  ;;  %549 = vst [vmem:[%s1120_s23 + $0x88] sm:$0xff] %v399_v5  ;;  %v402_v8 = vpop.f32.mrb[10].mxu0 }
 0x12a   : > { %551 = vst [vmem:[%s1120_s23 + $0x98] sm:$0xff] %v512_v7  ;;  %v403_v9 = vadd.f32 %v402_v8, %v1109_v28  ;;  %v515_v10 = vpop.f32.mrb[10].mxu1  ;;  %v404_v11 = vpop.f32.mrb[11].mxu0 }
 0x12b   : > { %v516_v12 = vadd.f32 %v515_v10, %v1111_v29  ;;  %v405_v13 = vadd.f32 %v404_v11, %v1113_v30  ;;  %v517_v14 = vpop.f32.mrb[11].mxu1 }
 0x12c   : > { %552 = vst [vmem:[%s1120_s23 + $0xa0] sm:$0xff] %v403_v9  ;;  %v518_v15 = vadd.f32 %v517_v14, %v1115_v31 }
 0x12d   : > { %554 = vst [vmem:[%s1120_s23 + $0xb0] sm:$0xff] %v516_v12  ;;  %553 = vst [vmem:[%s1120_s23 + $0xa8] sm:$0xff] %v405_v13  ;;  %v408_v16 = vpop.f32.mrb[12].mxu0 }
 0x12e   : > { %555 = vst [vmem:[%s1120_s23 + $0xb8] sm:$0xff] %v518_v15  ;;  %v409_v17 = vadd.f32 %v408_v16, %v1109_v28  ;;  %v521_v18 = vpop.f32.mrb[12].mxu1  ;;  %v410_v19 = vpop.f32.mrb[13].mxu0 }
 0x12f   : > { %v522_v20 = vadd.f32 %v521_v18, %v1111_v29  ;;  %v411_v21 = vadd.f32 %v410_v19, %v1113_v30  ;;  %v523_v22 = vpop.f32.mrb[13].mxu1 }
 0x130   : > { %556 = vst [vmem:[%s1120_s23 + $0xc0] sm:$0xff] %v409_v17  ;;  %v524_v23 = vadd.f32 %v523_v22, %v1115_v31 }
 0x131   : > { %558 = vst [vmem:[%s1120_s23 + $0xd0] sm:$0xff] %v522_v20  ;;  %557 = vst [vmem:[%s1120_s23 + $0xc8] sm:$0xff] %v411_v21  ;;  %v414_v24 = vpop.f32.mrb[14].mxu0 }
 0x132   : > { %559 = vst [vmem:[%s1120_s23 + $0xd8] sm:$0xff] %v524_v23  ;;  %v415_v25 = vadd.f32 %v414_v24, %v1109_v28  ;;  %v527_v26 = vpop.f32.mrb[14].mxu1  ;;  %v416_v27 = vpop.f32.mrb[15].mxu0 }
 0x133   : > { %v528_v32 = vadd.f32 %v527_v26, %v1111_v29  ;;  %v417_v33 = vadd.f32 %v416_v27, %v1113_v30  ;;  %v529_v34 = vpop.f32.mrb[15].mxu1 }
 0x134   : > { %560 = vst [vmem:[%s1120_s23 + $0xe0] sm:$0xff] %v415_v25  ;;  %v530_v28 = vadd.f32 %v529_v34, %v1115_v31 }
 0x135   : > { %562 = vst [vmem:[%s1120_s23 + $0xf0] sm:$0xff] %v528_v32  ;;  %561 = vst [vmem:[%s1120_s23 + $0xe8] sm:$0xff] %v417_v33 }
 0x136   : > { %563 = vst [vmem:[%s1120_s23 + $0xf8] sm:$0xff] %v530_v28 }
 0x137   : > { %845 = shalt.err (!%p842_p4)
}
 0x138   : > { %s846_s24 = scalar_lea.hbm %s1183_s4, 4096  ;;  %s850_s9 = scalar_lea.hbm %s1242_s3, 8192 }
 0x139   : > { %p847_p7 = scmp.ne.s32.totalorder %s1183_s4, %s846_s24  ;;  %p851_p1 = scmp.lt.u32.totalorder %s1183_s4, %s1242_s3 }
 0x13a   : > { %p852_p3 = scmp.lt.u32.totalorder %s850_s9, %s846_s24  ;;  %p854_p9 = scmp.lt.u32.totalorder %s846_s24, %s1183_s4 }
 0x13b   : > { %p848_p10 = pnand %p847_p7, %p1250_p11 }
 0x13c   : > { %p853_p8 = por %p852_p3, %p851_p1 }
 0x13d   : > { %p849_p12 = pneg %p848_p10 }
 0x13e   : > { %p855_p0 = por %p854_p9, %p853_p8 }
 0x140   : > { %p856_p6 = pnand %p855_p0, %p849_p12 }
 0x142   : > { %859 = shalt.err (!%p856_p6)
}
 0x143   : > { %s921_s23 = smov 512   ;;  %s922_s28 = smov 32  }
 0x144   : > { %737 = dma.vmem_to_hbm [thread:$0]  (%p1250_p11), %s1185_s29, 4096, %s1183_s4, %s565_s5, %s921_s23, %s921_s23, %s922_s28  }
 0x145 PF: > { %s596_s15 = sand.u32 1, %s894_s12   ;;  %p1251_p13 = scmp.ne.s32.totalorder %s1247_s27, 0 }
 0x146   : > { %p1252_p2 = scmp.ge.s32.totalorder %s914_s17, 2  ;;  %s597_s30 = scalar_lea.sflag [#allocation4], %s596_s15 }
 0x148   : > { %p744_p5 = pnand %p1252_p2, %p1251_p13 }
 0x14a   : > { %889 = dma.done.wait (!%p744_p5), %s597_s30, 4096  }
 0x14b   : > { %891 = vsyncadd (!%p744_p5), %s597_s30, 4294963200  ;;  %s19_s17 = sadd.s32 1, %s914_s17   ;;  %s1253_s12 = smov %s898_s13 }
 0x14c   : > { %p16_p4 = scmp.ge.s32.totalorder %s19_s17, 4   ;;  %s1254_s13 = smov %s902_s14 }
 0x14d   : > { %s1255_s14 = smov %s999_s26  ;;  %s1256_s15 = smov %s910_s16 }
 0x14e   : > { %s1257_s16 = smov %s1259_s20  ;;  %18 = sbr.rel (!%p16_p4) target bundleno = 6 (0x6), region = 83 }
 0x155   :  { %602 = vsyncpa [#allocation3], 1 }
 0x156   :  { %604 = vsyncpa [#allocation3 + $0x1], 1 }
 0x157   :  { %605 = vsyncpa [#allocation4], 1 }
 0x158   :  { %607 = vsyncpa [#allocation4 + $0x1], 1 }

</bundles_post_ra>
